<compile_context>
chip_gen: v7x
topology: tpu7x:2x2x1
jax: 0.10.0
libtpu: 0.0.40
codegen_flags: <defaults>
</compile_context>

<pallas_src>
import jax
import jax.numpy as jnp
import numpy as np
from jax.experimental import pallas as pl
from jax.experimental.pallas import tpu as pltpu


# ---------------------------------------------------------------------------
# Fused kernel: one original-batch element per grid step.
#   sigma_ref  : [B]      SMEM
#   scales_ref : [2]      SMEM  -> [text_cfg_scale, image_cfg_scale]
#   z_ref      : [1, C, HW]     latent (channels-on-sublanes, spatial-on-lanes)
#   cc_c_ref   : [1, C, HW]     cond  c_concat
#   cc_u_ref   : [1, C, HW]     uncond c_concat
#   ca_c_ref   : [1, D, S]      cond  c_crossattn (pre-transposed)
#   ca_u_ref   : [1, D, S]      uncond c_crossattn (pre-transposed)
#   w1z_t_ref  : [C, C]         1x1-conv weight, z-channel half, transposed
#   w1c_t_ref  : [C, C]         1x1-conv weight, c_concat half, transposed
#   wctx_t_ref : [C, D]         context projection weight, transposed
#   o_ref      : [1, C, HW]     final CFG-combined output
# ---------------------------------------------------------------------------
def _fused_cfg_kernel(sigma_ref, scales_ref,
                      z_ref, cc_c_ref, cc_u_ref, ca_c_ref, ca_u_ref,
                      w1z_t_ref, w1c_t_ref, wctx_t_ref, o_ref):
    b = pl.program_id(0)
    sig = sigma_ref[b]
    t_scale = scales_ref[0]
    i_scale = scales_ref[1]

    z = z_ref[0]            # [C, HW]
    cc_c = cc_c_ref[0]      # [C, HW]
    cc_u = cc_u_ref[0]      # [C, HW]

    # 1x1 conv over [z ; c_concat] channels.  cfg_z = repeat(z, 3), so the z-part
    # of the matmul is shared across all three CFG slots.  Lane-dense N = HW = 256.
    h_z = jnp.dot(w1z_t_ref[...], z, preferred_element_type=jnp.float32)          # [C, HW]
    h_cc_cond = h_z + jnp.dot(w1c_t_ref[...], cc_c,
                              preferred_element_type=jnp.float32)                 # slots 0,1
    h_cc_unc = h_z + jnp.dot(w1c_t_ref[...], cc_u,
                             preferred_element_type=jnp.float32)                  # slot 2

    # Context projection of mean-pooled crossattn tokens.  mean and matmul commute:
    #   mean_s(ca) @ w_ctx  ==  mean_s(w_ctx.T @ ca.T)   -> [C, 1] column, broadcasts
    # over the HW lanes with no in-kernel transpose.  Cond projection computed once
    # (slots 0 and 2 share it).
    p_cond = jnp.mean(jnp.dot(wctx_t_ref[...], ca_c_ref[0],
                              preferred_element_type=jnp.float32),
                      axis=1, keepdims=True)                                       # [C, 1]
    p_unc = jnp.mean(jnp.dot(wctx_t_ref[...], ca_u_ref[0],
                             preferred_element_type=jnp.float32),
                     axis=1, keepdims=True)                                        # [C, 1]

    scale = 1.0 + sig
    out_cond = h_cc_cond * scale + p_cond    # slot 0: (c_concat=cond,   crossattn=cond)
    out_img = h_cc_cond * scale + p_unc      # slot 1: (c_concat=cond,   crossattn=uncond)
    out_txt = h_cc_unc * scale + p_cond      # slot 2: (c_concat=uncond, crossattn=cond)

    o_ref[0] = (0.5 * (out_img + out_txt)
                + t_scale * (out_cond - out_img)
                + i_scale * (out_cond - out_txt)).astype(o_ref.dtype)


# ---------------------------------------------------------------------------
# Wrapper: reproduces CFGDenoiser.forward semantics.
# ---------------------------------------------------------------------------
def cfg_denoiser_forward(z, sigma, cond, uncond, text_cfg_scale, image_cfg_scale,
                         w1, w_ctx):
    """z: [B, C, H, W] (NCHW), sigma: [B],
    cond/uncond: dicts with 'c_crossattn': [[B, S, D]], 'c_concat': [[B, C, H, W]]."""
    B, C, H, W = z.shape
    HW = H * W
    S, D = cond["c_crossattn"][0].shape[1:]

    # NCHW -> [B, C, HW]: pure reshape (spatial is lane-dense, 256 = 2*128 lanes).
    z_f = z.reshape(B, C, HW)
    cc_cond = cond["c_concat"][0].reshape(B, C, HW)
    cc_unc = uncond["c_concat"][0].reshape(B, C, HW)

    # crossattn [B, S, D] -> [B, D, S] so the in-kernel projection lands as a [C, 1]
    # column (no in-kernel transposes).  Tiny host-side transpose.
    ca_cond = jnp.transpose(cond["c_crossattn"][0], (0, 2, 1))
    ca_unc = jnp.transpose(uncond["c_crossattn"][0], (0, 2, 1))

    # Split + transpose the tiny weights once on the host:
    #   x = [z ; cc] channel-concat, w1: [2C, C]  ->  h = w1[:C].T @ z + w1[C:].T @ cc
    w1_z_t = jnp.transpose(w1[:C])     # [C, C]
    w1_cc_t = jnp.transpose(w1[C:])    # [C, C]
    w_ctx_t = jnp.transpose(w_ctx)     # [C, D]

    scales = jnp.asarray([text_cfg_scale, image_cfg_scale], dtype=jnp.float32)

    out = pl.pallas_call(
        _fused_cfg_kernel,
        out_shape=jax.ShapeDtypeStruct((B, C, HW), jnp.float32),
        grid=(B,),
        in_specs=[
            pl.BlockSpec(memory_space=pltpu.MemorySpace.SMEM),          # sigma  [B]
            pl.BlockSpec(memory_space=pltpu.MemorySpace.SMEM),          # scales [2]
            pl.BlockSpec((1, C, HW), lambda b: (b, 0, 0)),              # z
            pl.BlockSpec((1, C, HW), lambda b: (b, 0, 0)),              # c_concat cond
            pl.BlockSpec((1, C, HW), lambda b: (b, 0, 0)),              # c_concat uncond
            pl.BlockSpec((1, D, S), lambda b: (b, 0, 0)),               # crossattn cond (T)
            pl.BlockSpec((1, D, S), lambda b: (b, 0, 0)),               # crossattn uncond (T)
            pl.BlockSpec((C, C), lambda b: (0, 0)),                     # w1 z-half^T
            pl.BlockSpec((C, C), lambda b: (0, 0)),                     # w1 cc-half^T
            pl.BlockSpec((C, D), lambda b: (0, 0)),                     # w_ctx^T
        ],
        out_specs=pl.BlockSpec((1, C, HW), lambda b: (b, 0, 0)),
        compiler_params=pltpu.CompilerParams(dimension_semantics=("parallel",)),
    )(sigma.astype(jnp.float32), scales,
      z_f, cc_cond, cc_unc, ca_cond, ca_unc, w1_z_t, w1_cc_t, w_ctx_t)

    # back to NCHW: pure reshape, no transpose.
    return out.reshape(B, C, H, W)


# ---------------------------------------------------------------------------
# Pure-JAX reference (same math as the original module: full 3x CFG replication,
# NCHW throughout) for correctness checking.
# ---------------------------------------------------------------------------
def cfg_denoiser_reference(z, sigma, cond, uncond, t_scale, i_scale, w1, w_ctx):
    B = z.shape[0]
    cfg_z = jnp.concatenate([z, z, z], axis=0)
    cfg_sigma = jnp.concatenate([sigma, sigma, sigma], axis=0)
    cfg_ca = jnp.concatenate([cond["c_crossattn"][0], uncond["c_crossattn"][0],
                              cond["c_crossattn"][0]], axis=0)
    cfg_cc = jnp.concatenate([cond["c_concat"][0], cond["c_concat"][0],
                              uncond["c_concat"][0]], axis=0)

    x = jnp.concatenate([cfg_z, cfg_cc], axis=1)                    # [3B, 2C, H, W]
    h = jnp.einsum("bchw,cd->bdhw", x, w1)
    ctx = jnp.mean(cfg_ca, axis=1) @ w_ctx                          # [3B, C]
    out = h * (1.0 + cfg_sigma)[:, None, None, None] + ctx[:, :, None, None]

    out_cond, out_img, out_txt = out[:B], out[B:2 * B], out[2 * B:]
    return (0.5 * (out_img + out_txt)
            + t_scale * (out_cond - out_img)
            + i_scale * (out_cond - out_txt))


if __name__ == "__main__":
    B, C, H, W = 2, 4, 16, 16
    S, D = 8, 32

    key = jax.random.PRNGKey(0)
    k = jax.random.split(key, 8)
    z = jax.random.normal(k[0], (B, C, H, W), dtype=jnp.float32)
    sigma = jax.random.uniform(k[1], (B,), dtype=jnp.float32)
    cond = {
        "c_crossattn": [jax.random.normal(k[2], (B, S, D), dtype=jnp.float32)],
        "c_concat": [jax.random.normal(k[3], (B, C, H, W), dtype=jnp.float32)],
    }
    uncond = {
        "c_crossattn": [jax.random.normal(k[4], (B, S, D), dtype=jnp.float32)],
        "c_concat": [jnp.zeros((B, C, H, W), dtype=jnp.float32)],
    }
    # deterministic synthetic inner-model parameters
    w1 = jax.random.normal(k[5], (2 * C, C), dtype=jnp.float32) * 0.1
    w_ctx = jax.random.normal(k[6], (D, C), dtype=jnp.float32) * 0.1

    text_cfg_scale = 7.5
    image_cfg_scale = 1.5

    out = cfg_denoiser_forward(z, sigma, cond, uncond,
                               text_cfg_scale, image_cfg_scale, w1, w_ctx)
    out = jax.block_until_ready(out)

    ref = cfg_denoiser_reference(z, sigma, cond, uncond,
                                 text_cfg_scale, image_cfg_scale, w1, w_ctx)
    np.testing.assert_allclose(np.asarray(out), np.asarray(ref), rtol=1e-5, atol=1e-5)

    print("KERNEL_OK")
</pallas_src>

<mosaic_0001>
module attributes {stable_mosaic.version = 11 : i64} {
  func.func @_fused_cfg_kernel(%arg0: i32, %arg1: memref<2xf32, #tpu.memory_space<smem>>, %arg2: memref<2xf32, #tpu.memory_space<smem>>, %arg3: memref<1x4x256xf32, #tpu.memory_space<vmem>>, %arg4: memref<1x4x256xf32, #tpu.memory_space<vmem>>, %arg5: memref<1x4x256xf32, #tpu.memory_space<vmem>>, %arg6: memref<1x32x8xf32, #tpu.memory_space<vmem>>, %arg7: memref<1x32x8xf32, #tpu.memory_space<vmem>>, %arg8: memref<4x4xf32, #tpu.memory_space<vmem>>, %arg9: memref<4x4xf32, #tpu.memory_space<vmem>>, %arg10: memref<4x32xf32, #tpu.memory_space<vmem>>, %arg11: memref<1x4x256xf32, #tpu.memory_space<vmem>>) attributes {dimension_semantics = [#tpu.dimension_semantics<parallel>], iteration_bounds = array<i64: 2>, scalar_prefetch = 0 : i64, scratch_operands = 0 : i64, tpu.core_type = #tpu.core_type<tc>, window_params = [{transform_indices = @transform_0, window_bounds = array<i64: 2>}, {transform_indices = @transform_1, window_bounds = array<i64: 2>}, {transform_indices = @transform_2, window_bounds = array<i64: 1, 4, 256>}, {transform_indices = @transform_3, window_bounds = array<i64: 1, 4, 256>}, {transform_indices = @transform_4, window_bounds = array<i64: 1, 4, 256>}, {transform_indices = @transform_5, window_bounds = array<i64: 1, 32, 8>}, {transform_indices = @transform_6, window_bounds = array<i64: 1, 32, 8>}, {pipeline_mode = #tpu.pipeline_mode<synchronous>, transform_indices = @transform_7, window_bounds = array<i64: 4, 4>}, {pipeline_mode = #tpu.pipeline_mode<synchronous>, transform_indices = @transform_8, window_bounds = array<i64: 4, 4>}, {pipeline_mode = #tpu.pipeline_mode<synchronous>, transform_indices = @transform_9, window_bounds = array<i64: 4, 32>}, {transform_indices = @transform_10, window_bounds = array<i64: 1, 4, 256>}]} {
    %0 = arith.index_cast %arg0 : i32 to index
    %1 = memref.load %arg1[%0] : memref<2xf32, #tpu.memory_space<smem>>
    %c0 = arith.constant 0 : index
    %2 = memref.load %arg2[%c0] : memref<2xf32, #tpu.memory_space<smem>>
    %c1 = arith.constant 1 : index
    %3 = memref.load %arg2[%c1] : memref<2xf32, #tpu.memory_space<smem>>
    %c0_0 = arith.constant 0 : index
    %c0_1 = arith.constant 0 : index
    %c0_2 = arith.constant 0 : index
    %4 = vector.load %arg3[%c0_0, %c0_1, %c0_2] : memref<1x4x256xf32, #tpu.memory_space<vmem>>, vector<1x4x256xf32>
    %5 = vector.shape_cast %4 : vector<1x4x256xf32> to vector<4x256xf32>
    %c0_3 = arith.constant 0 : index
    %c0_4 = arith.constant 0 : index
    %c0_5 = arith.constant 0 : index
    %6 = vector.load %arg4[%c0_3, %c0_4, %c0_5] : memref<1x4x256xf32, #tpu.memory_space<vmem>>, vector<1x4x256xf32>
    %7 = vector.shape_cast %6 : vector<1x4x256xf32> to vector<4x256xf32>
    %c0_6 = arith.constant 0 : index
    %c0_7 = arith.constant 0 : index
    %c0_8 = arith.constant 0 : index
    %8 = vector.load %arg5[%c0_6, %c0_7, %c0_8] : memref<1x4x256xf32, #tpu.memory_space<vmem>>, vector<1x4x256xf32>
    %9 = vector.shape_cast %8 : vector<1x4x256xf32> to vector<4x256xf32>
    %c0_9 = arith.constant 0 : index
    %c0_10 = arith.constant 0 : index
    %10 = vector.load %arg8[%c0_9, %c0_10] : memref<4x4xf32, #tpu.memory_space<vmem>>, vector<4x4xf32>
    %cst = arith.constant dense<0.000000e+00> : vector<4x256xf32>
    %11 = tpu.matmul %10, %5, %cst {dimension_numbers = #tpu.dot_dimension_numbers<[1], [0], [0], [1], [0, 0, 1, 1], [], []>} : vector<4x4xf32>, vector<4x256xf32>, vector<4x256xf32> -> vector<4x256xf32>
    %c0_11 = arith.constant 0 : index
    %c0_12 = arith.constant 0 : index
    %12 = vector.load %arg9[%c0_11, %c0_12] : memref<4x4xf32, #tpu.memory_space<vmem>>, vector<4x4xf32>
    %cst_13 = arith.constant dense<0.000000e+00> : vector<4x256xf32>
    %13 = tpu.matmul %12, %7, %cst_13 {dimension_numbers = #tpu.dot_dimension_numbers<[1], [0], [0], [1], [0, 0, 1, 1], [], []>} : vector<4x4xf32>, vector<4x256xf32>, vector<4x256xf32> -> vector<4x256xf32>
    %14 = arith.addf %11, %13 : vector<4x256xf32>
    %c0_14 = arith.constant 0 : index
    %c0_15 = arith.constant 0 : index
    %15 = vector.load %arg9[%c0_14, %c0_15] : memref<4x4xf32, #tpu.memory_space<vmem>>, vector<4x4xf32>
    %cst_16 = arith.constant dense<0.000000e+00> : vector<4x256xf32>
    %16 = tpu.matmul %15, %9, %cst_16 {dimension_numbers = #tpu.dot_dimension_numbers<[1], [0], [0], [1], [0, 0, 1, 1], [], []>} : vector<4x4xf32>, vector<4x256xf32>, vector<4x256xf32> -> vector<4x256xf32>
    %17 = arith.addf %11, %16 : vector<4x256xf32>
    %c0_17 = arith.constant 0 : index
    %c0_18 = arith.constant 0 : index
    %18 = vector.load %arg10[%c0_17, %c0_18] : memref<4x32xf32, #tpu.memory_space<vmem>>, vector<4x32xf32>
    %c0_19 = arith.constant 0 : index
    %c0_20 = arith.constant 0 : index
    %c0_21 = arith.constant 0 : index
    %19 = vector.load %arg6[%c0_19, %c0_20, %c0_21] : memref<1x32x8xf32, #tpu.memory_space<vmem>>, vector<1x32x8xf32>
    %20 = vector.shape_cast %19 : vector<1x32x8xf32> to vector<32x8xf32>
    %cst_22 = arith.constant dense<0.000000e+00> : vector<4x8xf32>
    %21 = tpu.matmul %18, %20, %cst_22 {dimension_numbers = #tpu.dot_dimension_numbers<[1], [0], [0], [1], [0, 0, 1, 1], [], []>} : vector<4x32xf32>, vector<32x8xf32>, vector<4x8xf32> -> vector<4x8xf32>
    %cst_23 = arith.constant dense<0.000000e+00> : vector<4xf32>
    %22 = vector.multi_reduction <add>, %21, %cst_23 [1] : vector<4x8xf32> to vector<4xf32>
    %23 = vector.shape_cast %22 : vector<4xf32> to vector<4x1xf32>
    %cst_24 = arith.constant 8.000000e+00 : f32
    %24 = vector.broadcast %cst_24 : f32 to vector<4x1xf32>
    %25 = arith.divf %23, %24 : vector<4x1xf32>
    %c0_25 = arith.constant 0 : index
    %c0_26 = arith.constant 0 : index
    %26 = vector.load %arg10[%c0_25, %c0_26] : memref<4x32xf32, #tpu.memory_space<vmem>>, vector<4x32xf32>
    %c0_27 = arith.constant 0 : index
    %c0_28 = arith.constant 0 : index
    %c0_29 = arith.constant 0 : index
    %27 = vector.load %arg7[%c0_27, %c0_28, %c0_29] : memref<1x32x8xf32, #tpu.memory_space<vmem>>, vector<1x32x8xf32>
    %28 = vector.shape_cast %27 : vector<1x32x8xf32> to vector<32x8xf32>
    %cst_30 = arith.constant dense<0.000000e+00> : vector<4x8xf32>
    %29 = tpu.matmul %26, %28, %cst_30 {dimension_numbers = #tpu.dot_dimension_numbers<[1], [0], [0], [1], [0, 0, 1, 1], [], []>} : vector<4x32xf32>, vector<32x8xf32>, vector<4x8xf32> -> vector<4x8xf32>
    %cst_31 = arith.constant dense<0.000000e+00> : vector<4xf32>
    %30 = vector.multi_reduction <add>, %29, %cst_31 [1] : vector<4x8xf32> to vector<4xf32>
    %31 = vector.shape_cast %30 : vector<4xf32> to vector<4x1xf32>
    %cst_32 = arith.constant 8.000000e+00 : f32
    %32 = vector.broadcast %cst_32 : f32 to vector<4x1xf32>
    %33 = arith.divf %31, %32 : vector<4x1xf32>
    %cst_33 = arith.constant 1.000000e+00 : f32
    %34 = arith.addf %cst_33, %1 : f32
    %35 = vector.broadcast %34 : f32 to vector<4x256xf32>
    %36 = arith.mulf %14, %35 : vector<4x256xf32>
    %37 = vector.broadcast %25 : vector<4x1xf32> to vector<4x256xf32>
    %38 = arith.addf %36, %37 : vector<4x256xf32>
    %39 = vector.broadcast %34 : f32 to vector<4x256xf32>
    %40 = arith.mulf %14, %39 : vector<4x256xf32>
    %41 = vector.broadcast %33 : vector<4x1xf32> to vector<4x256xf32>
    %42 = arith.addf %40, %41 : vector<4x256xf32>
    %43 = vector.broadcast %34 : f32 to vector<4x256xf32>
    %44 = arith.mulf %17, %43 : vector<4x256xf32>
    %45 = vector.broadcast %25 : vector<4x1xf32> to vector<4x256xf32>
    %46 = arith.addf %44, %45 : vector<4x256xf32>
    %47 = arith.addf %42, %46 : vector<4x256xf32>
    %cst_34 = arith.constant 5.000000e-01 : f32
    %48 = vector.broadcast %cst_34 : f32 to vector<4x256xf32>
    %49 = arith.mulf %48, %47 : vector<4x256xf32>
    %50 = arith.subf %38, %42 : vector<4x256xf32>
    %51 = vector.broadcast %2 : f32 to vector<4x256xf32>
    %52 = arith.mulf %51, %50 : vector<4x256xf32>
    %53 = arith.addf %49, %52 : vector<4x256xf32>
    %54 = arith.subf %38, %46 : vector<4x256xf32>
    %55 = vector.broadcast %3 : f32 to vector<4x256xf32>
    %56 = arith.mulf %55, %54 : vector<4x256xf32>
    %57 = arith.addf %53, %56 : vector<4x256xf32>
    %c0_35 = arith.constant 0 : index
    %c0_36 = arith.constant 0 : index
    %c0_37 = arith.constant 0 : index
    %58 = vector.load %arg11[%c0_35, %c0_36, %c0_37] : memref<1x4x256xf32, #tpu.memory_space<vmem>>, vector<1x4x256xf32>
    %59 = vector.shape_cast %58 : vector<1x4x256xf32> to vector<4x256xf32>
    %60 = vector.shape_cast %57 : vector<4x256xf32> to vector<1x4x256xf32>
    tpu.vector_store %arg11[%c0_35, %c0_36, %c0_37], %60 {strides = array<i32>} : memref<1x4x256xf32, #tpu.memory_space<vmem>>, vector<1x4x256xf32>,
    return
  }
  func.func @transform_0(%arg0: i32) -> i32 {
    %c0_i32 = arith.constant 0 : i32
    %c0_i32_0 = arith.constant 0 : i32
    return %c0_i32 : i32
  }
  func.func @transform_1(%arg0: i32) -> i32 {
    %c0_i32 = arith.constant 0 : i32
    %c0_i32_0 = arith.constant 0 : i32
    return %c0_i32 : i32
  }
  func.func @transform_2(%arg0: i32) -> (i32, i32, i32) {
    %c0_i32 = arith.constant 0 : i32
    %c0_i32_0 = arith.constant 0 : i32
    %c0_i32_1 = arith.constant 0 : i32
    return %arg0, %c0_i32, %c0_i32_0 : i32, i32, i32
  }
  func.func @transform_3(%arg0: i32) -> (i32, i32, i32) {
    %c0_i32 = arith.constant 0 : i32
    %c0_i32_0 = arith.constant 0 : i32
    %c0_i32_1 = arith.constant 0 : i32
    return %arg0, %c0_i32, %c0_i32_0 : i32, i32, i32
  }
  func.func @transform_4(%arg0: i32) -> (i32, i32, i32) {
    %c0_i32 = arith.constant 0 : i32
    %c0_i32_0 = arith.constant 0 : i32
    %c0_i32_1 = arith.constant 0 : i32
    return %arg0, %c0_i32, %c0_i32_0 : i32, i32, i32
  }
  func.func @transform_5(%arg0: i32) -> (i32, i32, i32) {
    %c0_i32 = arith.constant 0 : i32
    %c0_i32_0 = arith.constant 0 : i32
    %c0_i32_1 = arith.constant 0 : i32
    return %arg0, %c0_i32, %c0_i32_0 : i32, i32, i32
  }
  func.func @transform_6(%arg0: i32) -> (i32, i32, i32) {
    %c0_i32 = arith.constant 0 : i32
    %c0_i32_0 = arith.constant 0 : i32
    %c0_i32_1 = arith.constant 0 : i32
    return %arg0, %c0_i32, %c0_i32_0 : i32, i32, i32
  }
  func.func @transform_7(%arg0: i32) -> (i32, i32) {
    %c0_i32 = arith.constant 0 : i32
    %c0_i32_0 = arith.constant 0 : i32
    %c0_i32_1 = arith.constant 0 : i32
    return %c0_i32, %c0_i32_0 : i32, i32
  }
  func.func @transform_8(%arg0: i32) -> (i32, i32) {
    %c0_i32 = arith.constant 0 : i32
    %c0_i32_0 = arith.constant 0 : i32
    %c0_i32_1 = arith.constant 0 : i32
    return %c0_i32, %c0_i32_0 : i32, i32
  }
  func.func @transform_9(%arg0: i32) -> (i32, i32) {
    %c0_i32 = arith.constant 0 : i32
    %c0_i32_0 = arith.constant 0 : i32
    %c0_i32_1 = arith.constant 0 : i32
    return %c0_i32, %c0_i32_0 : i32, i32
  }
  func.func @transform_10(%arg0: i32) -> (i32, i32, i32) {
    %c0_i32 = arith.constant 0 : i32
    %c0_i32_0 = arith.constant 0 : i32
    %c0_i32_1 = arith.constant 0 : i32
    return %arg0, %c0_i32, %c0_i32_0 : i32, i32, i32
  }
}

</mosaic_0001>

<bundles_post_ra>
// kernel: tpu_custom_call.1
= control target key start
LH: loop header
LB: loop body
LE: loop exit
PB: predicated region body
PF: predicated region fallthrough
CT: control target
= control target key end

     0   :  { %s1539_s0 = inlined_call_operand.vmem [shape: f32[2], index: 0, kind: input, shape index: {}]   ;;  %s1540_s1 = inlined_call_operand.vmem [shape: f32[2], index: 1, kind: input, shape index: {}]   ;;  %s1541_s2 = inlined_call_operand.vmem [shape: f32[2,4,256], index: 2, kind: input, shape index: {}]   ;;  %s1542_s3 = inlined_call_operand.vmem [shape: f32[2,4,256], index: 3, kind: input, shape index: {}]   ;;  %s1543_s4 = inlined_call_operand.vmem [shape: f32[2,4,256], index: 4, kind: input, shape index: {}]   ;;  %s1544_s5 = inlined_call_operand.vmem [shape: f32[2,32,8], index: 5, kind: input, shape index: {}]   ;;  %s1545_s6 = inlined_call_operand.vmem [shape: f32[2,32,8], index: 6, kind: input, shape index: {}]   ;;  %s1546_s7 = inlined_call_operand.vmem [shape: f32[4,4], index: 7, kind: input, shape index: {}]   ;;  %s1547_s8 = inlined_call_operand.vmem [shape: f32[4,4], index: 8, kind: input, shape index: {}]   ;;  %s1548_s9 = inlined_call_operand.vmem [shape: f32[4,32], index: 9, kind: input, shape index: {}]   ;;  %s1549_s10 = inlined_call_operand.hbm [shape: f32[2,4,256], index: 10, kind: output, shape index: {}]  }
   0x1   :  { %1556 = sst [smem:[#allocation14_spill]] %s1539_s0 }
   0x2   :  { %1557 = sst [smem:[#allocation15_spill]] %s1540_s1 }
   0x3   :  { %15 = vsyncpa [#allocation4], 0 }
   0x4   :  { %16 = vsyncpa [#allocation6], 0 }
   0x5   :  { %17 = vsyncpa [#allocation3], 0 }
   0x6   :  { %19 = vsyncpa [#allocation3 + $0x1], 0  ;;  %s1373_s13 = smov 0   ;;  %s1375_s14 = smov 0  }
   0x7   :  { %s1377_s15 = smov 0   ;;  %s1379_s16 = smov 0  }
   0x8 LB: > { %1558 = sst [smem:[#allocation11_spill]] %s1306_s15  ;;  %s1394_s17 = sadd.s32 4294967295, %s1310_s16   ;;  %s1310_s16 = sphi %s1379_s16, %s1574_s16   ;;  %s1306_s15 = sphi %s1377_s15, %s1576_s15   ;;  %s1302_s14 = sphi %s1375_s14, %s1578_s14   ;;  %s1298_s13 = sphi %s1373_s13, %s1577_s13  }
   0x9   : > { %s1058_s18 = sadd.s32 4294967294, %s1310_s16   ;;  %s1398_s19 = sadd.s32 1, %s1310_s16  }
   0xa   : > { %1559 = sst [smem:[#allocation12_spill]] %s1398_s19  ;;  %s267_s20 = sadd.s32 1, %s1306_s15 }
   0xb   : > { %s264_s21 = ssub.s32 %s1310_s16, %s1398_s19  ;;  %p277_p0 = scmp.ne.s32.totalorder %s1306_s15, %s1302_s14 }
   0xc   : > { %p265_p1 = scmp.eq.s32.totalorder %s264_s21, 0  ;;  %p278_p2 = scmp.eq.s32.totalorder %s1394_s17, 1 }
   0xd   : > { %p283_p3 = scmp.ne.s32.totalorder %s1302_s14, %s1298_s13  ;;  %p284_p4 = scmp.eq.s32.totalorder %s1058_s18, 1 }
   0xe   : > { %s1409_s22 = scalar_select %p265_p1, %s1306_s15, %s267_s20  }
   0xf   : > { %p1411_p5 = por %p278_p2, %p277_p0  ;;  %p1415_p6 = por %p284_p4, %p283_p3 }
  0x10   : > { %1560 = sst [smem:[#allocation13_spill]] %s1409_s22  ;;  %p1059_p7 = scmp.ge.s32.totalorder %s1310_s16, 1 }
  0x11   : > { %s1561_s23 = scalar_select %p1411_p5, 1, 0 }
  0x12   : > { %s1562_s24 = scalar_select %p1415_p6, 1, 0 }
  0x13   : > { %p291_p8 = scmp.lt.s32.totalorder %s1310_s16, 3  ;;  %p1550_p9 = scmp.eq.s32.totalorder %s1394_s17, 0 }
  0x14   : > { %s1564_s0 = sld [smem:[#allocation14_spill]]  ;;  %s1565_s1 = sld [smem:[#allocation15_spill]] }
  0x15   : > { %p1422_p10 = pnand %p1059_p7, %p291_p8 }
  0x17   : > { %s1563_s25 = scalar_select %p1422_p10, 1, 0 }
  0x18   : > { %p1154_p11 = pneg %p1422_p10 }
  0x1a   : > { %s304_s28 = sshll.u32 %s1564_s0, 4  ;;  %s315_s11 = sshll.u32 %s1565_s1, 4  ;;  %s305_s28 = int_to_ptr.vmem [resolvable:$true] %s304_s28  ;;  %s316_s11 = int_to_ptr.vmem [resolvable:$true] %s315_s11 }
  0x1b   : > { %p1436_p12 = pnand %p1550_p9, %p1154_p11  ;;  %s1210_s18 = scalar_lea.vmem %s305_s28, 16 }
  0x1c   : > { %p1211_p13 = scmp.ne.s32.totalorder %s305_s28, %s1210_s18  ;;  %p1218_p3 = scmp.lt.s32.totalorder %s305_s28, %s305_s28 }
  0x1d   : > { %p1212_p0 = pneg %p1436_p12  ;;  %p1219_p4 = scmp.lt.s32.totalorder %s1210_s18, %s1210_s18 }
  0x1f   : > { %p1213_p1 = pnand %p1212_p0, %p1211_p13  ;;  %p1220_p7 = por %p1219_p4, %p1218_p3 }
  0x21   : > { %p1214_p2 = pneg %p1213_p1 }
  0x23   : > { %p1221_p8 = pnand %p1220_p7, %p1214_p2 }
  0x25   : > { %1224 = shalt.err (!%p1221_p8)
}
  0x26   : > { %s1312_s20 = smov [#allocation2]   ;;  %s1225_s21 = scalar_lea.vmem %s316_s11, 16 }
  0x27   : > { %1157 = dma.vmem_to_smem (!%p1436_p12), %s305_s28, 16, %s1312_s20, [#allocation4]  }
  0x28   : > { %p1226_p11 = scmp.ne.s32.totalorder %s316_s11, %s1225_s21  ;;  %p1233_p5 = scmp.lt.s32.totalorder %s316_s11, %s316_s11 }
  0x29   : > { %p1234_p10 = scmp.lt.s32.totalorder %s1225_s21, %s1225_s21 }
  0x2a   : > { %p1228_p9 = pnand %p1226_p11, %p1212_p0 }
  0x2b   : > { %p1235_p13 = por %p1234_p10, %p1233_p5 }
  0x2c   : > { %p1229_p6 = pneg %p1228_p9 }
  0x2e   : > { %p1236_p1 = pnand %p1235_p13, %p1229_p6 }
  0x30   : > { %1239 = shalt.err (!%p1236_p1)
}
  0x31   : > { %s1313_s26 = smov [#allocation5]   ;;  %p1567_p2 = scmp.ne.s32.totalorder %s1563_s25, 0 }
  0x32   : > { %1160 = dma.vmem_to_smem (!%p1436_p12), %s316_s11, 16, %s1313_s26, [#allocation6]  }
  0x33   : > { %377 = sbr.rel (%p1567_p2) target bundleno = 474 (0x1da), region = 60  ;;  %p1568_p3 = scmp.eq.s32.totalorder (!%p1567_p2), %s1394_s17, 0 }
  0x3a   : > { %1285 = dma.done.wait (%p1568_p3), [#allocation4], 16   ;;  %p1569_p4 = pmov %p1568_p3 }
  0x3b   : > { %p1570_p9 = pmov %p1568_p3 }
  0x3c   : > { %1287 = vsyncadd (%p1569_p4), [#allocation4], 4294967280 }
  0x3d   : > { %1289 = dma.done.wait (%p1570_p9), [#allocation6], 16   ;;  %p1571_p5 = pmov %p1568_p3 }
  0x3f   : > { %1291 = vsyncadd (%p1571_p5), [#allocation6], 4294967280 }
  0x40   : > { %387 = sfence }
  0x41   : > { %p440_p6 = scmp.lt.s32.totalorder %s1394_s17, 1  ;;  %v1314_v0 = vmov 0.0   ;;  %vm478_vm0 = vcmask 1043456   ;;  %v471_v7 = vld [vmem:[%s1546_s7] sm:$0xf]  ;;  %vm474_vm1 = vcmask 31744  }
  0x42   : > { %547 = vmatprep.mubr.f32.mxu0 %v1314_v0  ;;  %628 = vmatprep.mubr.f32.mxu1 %v1314_v0  ;;  %v554_v10 = vld [vmem:[%s1547_s8] sm:$0xf]  ;;  %v1315_v16 = vmov 0.0|0.0   ;;  %vm1316_vm2 = vmmov 0   ;;  %vm721_vm3 = vcmask 261120   ;;  %vm795_vm4 = vcmask 60416  }
  0x43   : > { %s441_s25 = scalar_select %p440_p6, %s1394_s17, 1  ;;  %v716_v22 = vld [vmem:[%s1548_s9] sm:$0xf] }
  0x44   : > { %s437_s18 = sand.u32 1, %s1302_s14   ;;  %s1099_s21 = sshll.u32 %s1394_s17, 7 }
  0x45   : > { %s1094_s27 = sshll.u32 %s441_s25, 3  ;;  %s1097_s28 = sshll.u32 %s441_s25, 5 }
  0x46   : > { %s444_s11 = scalar_lea.vmem %s1541_s2, %s1094_s27  ;;  %s454_s20 = scalar_lea.vmem %s1543_s4, %s1094_s27 }
  0x47   : > { %s459_s0 = scalar_lea.vmem %s1544_s5, %s1097_s28  ;;  %v468_v1 = vld [vmem:[%s444_s11] sm:$0xff]  ;;  %s464_s15 = scalar_lea.vmem %s1545_s6, %s1097_s28 }
  0x48   : > { %v470_v2 = vld [vmem:[%s454_s20] sm:$0xff]  ;;  %v473_v3 = vcombine.high %v468_v1, %v468_v1  ;;  %s449_s29 = scalar_lea.vmem %s1542_s3, %s1094_s27  ;;  %v718_v5 = vld [vmem:[%s459_s0 + $0x8] sm:$0xff]  ;;  %v719_v14 = vld [vmem:[%s459_s0 + $0x10] sm:$0xff]  ;;  %s466_s28 = sld [smem:[#allocation5]] }
  0x49   : > { %v717_v4 = vld [vmem:[%s459_s0] sm:$0xff]  ;;  %v638_v8 = vcombine.high %v470_v2, %v470_v2  ;;  %v802_v13 = vld [vmem:[%s464_s15 + $0x8] sm:$0xff]  ;;  %v720_v15 = vld [vmem:[%s459_s0 + $0x18] sm:$0xff]  ;;  %s1077_s11 = sld [smem:[#allocation5 + $0x1]]  ;;  %s1066_s20 = sshll.u32 %s437_s18, 3 }
  0x4a   : > { %v469_v6 = vld [vmem:[%s449_s29] sm:$0xff]  ;;  %1078 = vmatprep.subr.msk.mxu0 %vm478_vm0, %v473_v3  ;;  %v1133_v11 = vpack.c.bf16 %v718_v5, %v717_v4  ;;  %v1136_v18 = vpack.c.bf16 %v720_v15, %v719_v14  ;;  %v803_v19 = vld [vmem:[%s464_s15 + $0x10] sm:$0xff]  ;;  %v804_v20 = vld [vmem:[%s464_s15 + $0x18] sm:$0xff]  ;;  %s439_s26 = scalar_lea.vmem [#allocation7], %s1066_s20  ;;  %s1497_s12 = scalar_lea.hbm %s1549_s10, %s1099_s21 }
  0x4b   : > { %v556_v9 = vcombine.high %v469_v6, %v469_v6  ;;  %1079 = vmatpush1.msk.msra.mxu0 %vm478_vm0, %v468_v1  ;;  %v801_v12 = vld [vmem:[%s464_s15] sm:$0xff]  ;;  %v1142_v21 = vpack.c.bf16 %v804_v20, %v803_v19  ;;  %s465_s15 = sld [smem:[#allocation2 + %s1394_s17]]  ;;  %s929_s25 = sshll.u32 %s439_s26, 4  ;;  %s1499_s25 = int_to_ptr.vmem [resolvable:$true] %s929_s25 }
  0x4c   : > { %1080 = vmatmul.mubr.msk.f32.vlgmr.msra.gmra.mrb[0].mxu0 %vm474_vm1, %v471_v7  ;;  %1084 = vmatprep.subr.msk.mxu0 %vm478_vm0, %v638_v8  ;;  %v1139_v17 = vpack.c.bf16 %v802_v13, %v801_v12  ;;  %s915_s1 = scalar_lea.sflag [#allocation3], %s437_s18  ;;  %s1240_s22 = scalar_lea.vmem %s1499_s25, 128 }
  0x4d   : > { %1081 = vmatprep.subr.msk.mxu1 %vm478_vm0, %v556_v9  ;;  %1085 = vmatpush1.msk.msra.mxu0 %vm478_vm0, %v470_v2  ;;  %p1241_p10 = scmp.ne.s32.totalorder %s1499_s25, %s1240_s22  ;;  %p1572_p12 = scmp.ne.s32.totalorder %s1561_s23, 0 }
  0x4e   : > { %1082 = vmatpush1.msk.msra.mxu1 %vm478_vm0, %v469_v6  ;;  %707 = vmatprep.mubr.f32.mxu0 %v1314_v0  ;;  %v897_v56 = vstv %s466_s28  ;;  %s1317_s17 = smov [#allocation7]  }
  0x4f   : > { %1083 = vmatmul.mubr.msk.f32.vlgmr.msra.gmra.mrb[0].mxu1 %vm474_vm1, %v554_v10  ;;  %1132 = vmatprep.subr.bf16.mxu1 %v1315_v16  ;;  %v904_v61 = vstv %s1077_s11  ;;  %p1242_p0 = pnand %p1241_p10, %p1572_p12  ;;  %s1244_s0 = sshll.u32 %s1317_s17, 4  ;;  %s1245_s0 = int_to_ptr.vmem [resolvable:$false] %s1244_s0 }
  0x50   : > { %1134 = vmatpush3.bf16.msra.mxu1 %v1133_v11  ;;  %1138 = vmatprep.subr.bf16.mxu0 %v1315_v16  ;;  %s1246_s19 = scalar_lea.vmem %s1245_s0, 256  ;;  %p1247_p8 = scmp.lt.s32.totalorder %s1499_s25, %s1245_s0 }
  0x51   : > { %1086 = vmatmul.mubr.msk.f32.vlgmr.msra.gmra.mrb[2].mxu0 %vm474_vm1, %v554_v10  ;;  %1135 = vmatprep.subr.bf16.mxu1 %v1315_v16  ;;  %s879_s27 = sadd.f32 1.0, %s465_s15  ;;  %p1243_p7 = pneg %p1242_p0 }
  0x52   : > { %1140 = vmatpush3.bf16.msra.mxu0 %v1139_v17  ;;  %1118 = vmatprep.mubr.msk.f32.mxu1 %vm1316_vm2, %v1314_v0  ;;  %p1248_p11 = scmp.lt.s32.totalorder %s1246_s19, %s1240_s22 }
  0x53   : > { %1141 = vmatprep.subr.bf16.mxu0 %v1315_v16  ;;  %1129 = vmatprep.mubr.msk.f32.mxu0 %vm1316_vm2, %v1314_v0  ;;  %v880_v39 = vstv %s879_s27 }
  0x54   : > { %1137 = vmatpush3.bf16.msra.mxu1 %v1136_v18  ;;  %p1249_p13 = por %p1248_p11, %p1247_p8 }
  0x56   : > { %1143 = vmatpush3.bf16.msra.mxu0 %v1142_v21  ;;  %p1250_p1 = pnand %p1249_p13, %p1243_p7 }
  0x57   : > { %1119 = vmatmul.mubr.msk.f32.vlgmr.msra.gmra.mrb[2].mxu1 %vm721_vm3, %v716_v22 }
  0x59   : > { %1130 = vmatmul.mubr.msk.f32.vlgmr.msra.gmra.mrb[4].mxu0 %vm721_vm3, %v716_v22 }
 0x11f   : > { %v549_v23 = vpop.f32.mrb[0].mxu0 }
 0x120   : > { %v551_v24 = vpop.f32.mrb[1].mxu0 }
 0x122   : > { %v630_v25 = vpop.f32.mrb[0].mxu1 }
 0x123   : > { %v635_v26 = vadd.f32 %v630_v25, %v549_v23  ;;  %v632_v27 = vpop.f32.mrb[1].mxu1 }
 0x124   : > { %v636_v28 = vadd.f32 %v632_v27, %v551_v24  ;;  %v709_v29 = vpop.f32.mrb[2].mxu0 }
 0x125   : > { %v714_v30 = vadd.f32 %v709_v29, %v549_v23  ;;  %v711_v31 = vpop.f32.mrb[3].mxu0  ;;  %v881_v40 = vmul.f32 %v880_v39, %v635_v26 }
 0x126   : > { %v715_v32 = vadd.f32 %v711_v31, %v551_v24  ;;  %v882_v42 = vmul.f32 %v880_v39, %v636_v28 }
 0x127   : > { %v887_v43 = vmul.f32 %v880_v39, %v714_v30 }
 0x128   : > { %v888_v44 = vmul.f32 %v880_v39, %v715_v32 }
 0x12a   : > { %v791_v33 = vpop.f32.mrb[2].mxu1 }
 0x12b   : > { %v1120_v34 = vpop.f32.mrb[3].mxu1  ;;  %v796_v35 = vsel %vm795_vm4, %v791_v33, 0.0 }
 0x12c   : > { %797 = vadd.xlane.f32.xlu0 %v796_v35  ;;  %v871_v36 = vpop.f32.mrb[4].mxu0 }
 0x12d   : > { %v1131_v37 = vpop.f32.mrb[5].mxu0  ;;  %v875_v38 = vsel %vm795_vm4, %v871_v36, 0.0 }
 0x130   : > { %876 = vadd.xlane.f32.xlu0 %v875_v38 }
 0x1b9   : > { %v798_v41 = vpop.xlane.xlu0 %797 }
 0x1ba   : > { %v800_v45 = vmul.f32 0.125, %v798_v41 }
 0x1bc   : > { %v883_v46 = vadd.f32 %v881_v40, %v800_v45  ;;  %v889_v47 = vadd.f32 %v887_v43, %v800_v45  ;;  %v884_v48 = vadd.f32 %v882_v42, %v800_v45  ;;  %v890_v49 = vadd.f32 %v888_v44, %v800_v45 }
 0x1bd   : > { %v877_v50 = vpop.xlane.xlu0 %876 }
 0x1be   : > { %v902_v51 = vsub.f32 %v883_v46, %v889_v47  ;;  %v878_v52 = vmul.f32 0.125, %v877_v50  ;;  %v903_v53 = vsub.f32 %v884_v48, %v890_v49 }
 0x1c0   : > { %v885_v54 = vadd.f32 %v881_v40, %v878_v52  ;;  %v886_v55 = vadd.f32 %v882_v42, %v878_v52  ;;  %v905_v4 = vmul.f32 %v904_v61, %v902_v51  ;;  %v906_v5 = vmul.f32 %v904_v61, %v903_v53 }
 0x1c2   : > { %v891_v57 = vadd.f32 %v889_v47, %v885_v54  ;;  %v892_v58 = vadd.f32 %v890_v49, %v886_v55  ;;  %v895_v59 = vsub.f32 %v883_v46, %v885_v54  ;;  %v896_v60 = vsub.f32 %v884_v48, %v886_v55 }
 0x1c4   : > { %v893_v62 = vmul.f32 0.5, %v891_v57  ;;  %v894_v63 = vmul.f32 0.5, %v892_v58  ;;  %v898_v0 = vmul.f32 %v897_v56, %v895_v59  ;;  %v899_v1 = vmul.f32 %v897_v56, %v896_v60 }
 0x1c6   : > { %v900_v2 = vadd.f32 %v898_v0, %v893_v62  ;;  %v901_v3 = vadd.f32 %v899_v1, %v894_v63 }
 0x1c8   : > { %v907_v6 = vadd.f32 %v905_v4, %v900_v2  ;;  %v908_v7 = vadd.f32 %v906_v5, %v901_v3 }
 0x1ca   : > { %v911_v8 = vcombine.low %v907_v6, %v908_v7 }
 0x1cc   : > { %913 = vst [vmem:[%s439_s26] sm:$0xff] %v911_v8 }
 0x1cd   : > { %1253 = shalt.err (!%p1250_p1)
}
 0x1ce   : > { %s1254_s15 = scalar_lea.hbm %s1497_s12, 128  ;;  %s1258_s11 = scalar_lea.hbm %s1549_s10, 256 }
 0x1cf   : > { %p1255_p2 = scmp.ne.s32.totalorder %s1497_s12, %s1254_s15  ;;  %p1259_p9 = scmp.lt.u32.totalorder %s1497_s12, %s1549_s10 }
 0x1d0   : > { %p1260_p5 = scmp.lt.u32.totalorder %s1258_s11, %s1254_s15  ;;  %p1262_p10 = scmp.lt.u32.totalorder %s1254_s15, %s1497_s12 }
 0x1d1   : > { %p1256_p3 = pnand %p1255_p2, %p1572_p12 }
 0x1d2   : > { %p1261_p6 = por %p1260_p5, %p1259_p9 }
 0x1d3   : > { %p1257_p4 = pneg %p1256_p3 }
 0x1d4   : > { %p1263_p0 = por %p1262_p10, %p1261_p6 }
 0x1d6   : > { %p1264_p7 = pnand %p1263_p0, %p1257_p4 }
 0x1d8   : > { %1267 = shalt.err (!%p1264_p7)
}
 0x1d9   : > { %1152 = dma.vmem_to_hbm [thread:$0]  (%p1572_p12), %s1499_s25, 128, %s1497_s12, %s915_s1  }
 0x1da PF: > { %p1169_p8 = scmp.ge.s32.totalorder %s1310_s16, 2  ;;  %s941_s21 = sand.u32 1, %s1298_s13  }
 0x1db   : > { %p1573_p11 = scmp.ne.s32.totalorder %s1562_s24, 0  ;;  %s942_s26 = scalar_lea.sflag [#allocation3], %s941_s21 }
 0x1dd   : > { %p1162_p13 = pnand %p1169_p8, %p1573_p11 }
 0x1df   : > { %1293 = dma.done.wait (!%p1162_p13), %s942_s26, 128  }
 0x1e0   : > { %1295 = vsyncadd (!%p1162_p13), %s942_s26, 4294967168  ;;  %s1574_s16 = sld [smem:[#allocation12_spill]]  ;;  %s1575_s29 = sld [smem:[#allocation11_spill]] }
 0x1e1   : > { %s1576_s15 = sld [smem:[#allocation13_spill]]  ;;  %s1577_s13 = smov %s1302_s14 }
 0x1e6   : > { %p22_p1 = scmp.ge.s32.totalorder %s1574_s16, 4   ;;  %s1578_s14 = smov %s1575_s29 }
 0x1e8   :  { %24 = sbr.rel (!%p22_p1) target bundleno = 8 (0x8), region = 116 }
 0x1ef   :  { %947 = vsyncpa [#allocation3], 1 }
 0x1f0   :  { %949 = vsyncpa [#allocation3 + $0x1], 1 }
 0x1f1   :  { %950 = vsyncpa [#allocation4], 1 }
 0x1f2   :  { %952 = vsyncpa [#allocation4 + $0x1], 1 }
 0x1f3   :  { %953 = vsyncpa [#allocation6], 1 }

</bundles_post_ra>
